<compile_context>
chip_gen: v5e
topology: v5e:2x2
jax: 0.10.0
libtpu: 0.0.40
codegen_flags: <defaults>
</compile_context>

<pallas_src>
import math
import functools

import jax
import jax.numpy as jnp
from jax import lax
from jax.experimental import pallas as pl
from jax.experimental.pallas import tpu as pltpu

LN_EPS = 1e-5


def _embed_ln_kernel(tm, seq_len, ids_ref, table_ref, pos_ref, gb_ref,
                     out_ref, gbuf):
    """One grid step processes `tm` flattened (batch*seq) token rows.

    ids_ref:   (B*S,)  int32, SMEM (scalar prefetch)
    table_ref: (V, D)  stored dtype, VMEM-resident (constant block index)
    pos_ref:   (S, D)  f32,  VMEM-resident positional table
    gb_ref:    (2, D)  f32,  row 0 = gamma, row 1 = beta
    out_ref:   (tm, D) f32
    gbuf:      (tm, D) f32 VMEM scratch (gather destination)
    """
    t = pl.program_id(0)
    base = t * tm

    # In-kernel VMEM gather: one dynamic-slice load per token row + one per
    # positional row (fused add), upcast to f32, written into the scratch
    # tile.  No DMA descriptors / semaphores on the critical path; unrolled
    # by 8 so the LLO scheduler can overlap the loads.
    def gather_row(r, carry):
        tok = ids_ref[base + r]
        p = (base + r) % seq_len
        row = table_ref[pl.ds(tok, 1), :].astype(jnp.float32)
        row = row + pos_ref[pl.ds(p, 1), :]
        gbuf[pl.ds(r, 1), :] = row
        return carry

    lax.fori_loop(0, tm, gather_row, 0, unroll=min(8, tm))

    # LayerNorm over the feature dim, accumulated in f32.
    x = gbuf[...]
    mean = jnp.mean(x, axis=-1, keepdims=True)
    xc = x - mean
    var = jnp.mean(xc * xc, axis=-1, keepdims=True)
    y = xc * lax.rsqrt(var + LN_EPS)
    gamma = gb_ref[0:1, :]
    beta = gb_ref[1:2, :]
    out_ref[...] = (y * gamma + beta).astype(out_ref.dtype)


def _choose_row_tile(total_rows):
    # Prefer the largest tile (amortize per-step overhead) that still leaves
    # >= 2 grid steps so both v7x TensorCores get work; otherwise take the
    # largest divisor.
    for cand in (512, 256, 128, 64, 32, 16, 8):
        if total_rows % cand == 0 and total_rows // cand >= 2:
            return cand
    for cand in (512, 256, 128, 64, 32, 16, 8):
        if total_rows % cand == 0:
            return cand
    raise ValueError("batch*seq_len must be a multiple of 8")


def linformer_embedding_forward(ids, token_table, pos_source, gamma, beta):
    """ids: (B, S) int. Returns (B, S, D) float32."""
    B, S = ids.shape
    V, D = token_table.shape
    total = B * S
    tm = _choose_row_tile(total)
    num_tiles = total // tm

    # VMEM budget: assume Pallas may double-buffer the resident inputs even
    # with a constant index_map; reject tables that would not fit v7x's
    # 64 MiB VMEM with headroom.
    table_bytes = token_table.size * token_table.dtype.itemsize
    pos_bytes = pos_source.size * 4
    resident_bytes = 2 * (table_bytes + pos_bytes) + 6 * tm * D * 4 + (1 << 20)
    if resident_bytes > (48 << 20):
        # TODO(synk): HBM-resident double-buffered row-gather fallback.
        raise NotImplementedError(
            "token table too large for the VMEM-resident gather path")
    vmem_limit = int(min(max(resident_bytes + (4 << 20), 32 << 20), 60 << 20))

    # Clamp like jnp's gather (reference token_table[ids]); avoids OOB reads.
    ids_flat = jnp.clip(ids.reshape(total).astype(jnp.int32), 0, V - 1)
    gb = jnp.stack([gamma.astype(jnp.float32), beta.astype(jnp.float32)], 0)

    kernel = functools.partial(_embed_ln_kernel, tm, S)
    out = pl.pallas_call(
        kernel,
        out_shape=jax.ShapeDtypeStruct((total, D), jnp.float32),
        grid_spec=pltpu.PrefetchScalarGridSpec(
            num_scalar_prefetch=1,          # ids -> SMEM
            grid=(num_tiles,),
            in_specs=[
                # Token table: full block, constant index -> DMA'd once,
                # stays resident in VMEM, passed in its stored dtype.
                pl.BlockSpec((V, D), lambda t, ids: (0, 0)),
                # Positional table: full block, resident.
                pl.BlockSpec((S, D), lambda t, ids: (0, 0)),
                # gamma/beta packed.
                pl.BlockSpec((2, D), lambda t, ids: (0, 0)),
            ],
            out_specs=pl.BlockSpec((tm, D), lambda t, ids: (t, 0)),
            scratch_shapes=[pltpu.VMEM((tm, D), jnp.float32)],
        ),
        compiler_params=pltpu.CompilerParams(
            dimension_semantics=("parallel",),
            vmem_limit_bytes=vmem_limit),
    )(ids_flat, token_table, pos_source.astype(jnp.float32), gb)
    return out.reshape(B, S, D)


def make_sinusoidal_pe(length, d_model):
    position = jnp.arange(length, dtype=jnp.float32)[:, None]          # (L, 1)
    div_term = jnp.exp(jnp.arange(0, d_model, 2, dtype=jnp.float32)
                       * (-math.log(10000.0) / d_model))               # (D/2,)
    pe = jnp.zeros((length, d_model), dtype=jnp.float32)
    pe = pe.at[:, 0::2].set(jnp.sin(position * div_term))
    pe = pe.at[:, 1::2].set(jnp.cos(position * div_term))
    return pe


def init_params(key, pe_type, pooling_type, vocab_size, max_seq_len, embed_dim):
    k_tok, k_pos = jax.random.split(key)
    # nn.Embedding default init: N(0, 1)
    token_table = jax.random.normal(k_tok, (vocab_size, embed_dim), jnp.float32)
    if pooling_type == 'CLS':
        padding_idx = vocab_size - 2
        token_table = token_table.at[padding_idx].set(0.0)
    pos_table = jax.random.normal(k_pos, (max_seq_len, embed_dim), jnp.float32)
    # nn.LayerNorm default init
    gamma = jnp.ones((embed_dim,), jnp.float32)
    beta = jnp.zeros((embed_dim,), jnp.float32)
    sin_pe = make_sinusoidal_pe(max_seq_len, embed_dim)
    return token_table, pos_table, sin_pe, gamma, beta


def select_pos_source(pe_type, seq_len, pos_table, sin_pe, embed_dim):
    if pe_type == 'nope':
        return jnp.zeros((seq_len, embed_dim), jnp.float32)
    elif pe_type == 'spe':
        return sin_pe[:seq_len]
    elif pe_type == 'ape':
        # PyTorch module adds pos_embed(arange(max_seq_len)); requires
        # seq_len == max_seq_len, which we enforce in the example.
        return pos_table[:seq_len]
    else:
        raise ValueError(pe_type)


def reference_forward(ids, token_table, pos_source, gamma, beta):
    tok = token_table[ids]                              # (B, S, D)
    x = tok + pos_source[None, :, :]
    mean = jnp.mean(x, axis=-1, keepdims=True)
    var = jnp.mean((x - mean) ** 2, axis=-1, keepdims=True)
    y = (x - mean) * lax.rsqrt(var + LN_EPS)
    return y * gamma + beta


if __name__ == "__main__":
    # Small shapes consistent with the module.
    pe_type = 'ape'
    pooling_type = 'CLS'
    vocab_size = 128
    max_seq_len = 8
    embed_dim = 32
    batch = 2
    seq_len = max_seq_len   # required by the module's 'ape' branch

    key = jax.random.PRNGKey(0)
    k_param, k_ids = jax.random.split(key)
    token_table, pos_table, sin_pe, gamma, beta = init_params(
        k_param, pe_type, pooling_type, vocab_size, max_seq_len, embed_dim)

    ids = jax.random.randint(k_ids, (batch, seq_len), 0, vocab_size,
                             dtype=jnp.int32)
    pos_source = select_pos_source(pe_type, seq_len, pos_table, sin_pe,
                                   embed_dim)

    out = linformer_embedding_forward(ids, token_table, pos_source, gamma, beta)
    out = jax.block_until_ready(out)

    ref = reference_forward(ids, token_table, pos_source, gamma, beta)
    assert out.shape == (batch, seq_len, embed_dim)
    assert jnp.allclose(out, ref, atol=1e-5, rtol=1e-5), "mismatch vs reference"

    print("KERNEL_OK")
</pallas_src>

<mosaic_0001>
module attributes {stable_mosaic.version = 11 : i64} {
  func.func @_embed_ln_kernel(%arg0: i32, %arg1: memref<16xi32, #tpu.memory_space<smem>>, %arg2: memref<128x32xf32, #tpu.memory_space<vmem>>, %arg3: memref<8x32xf32, #tpu.memory_space<vmem>>, %arg4: memref<2x32xf32, #tpu.memory_space<vmem>>, %arg5: memref<8x32xf32, #tpu.memory_space<vmem>>, %arg6: memref<8x32xf32, #tpu.memory_space<vmem>>) attributes {dimension_semantics = [#tpu.dimension_semantics<parallel>], iteration_bounds = array<i64: 2>, scalar_prefetch = 1 : i64, scratch_operands = 1 : i64, tpu.core_type = #tpu.core_type<tc>, window_params = [{pipeline_mode = #tpu.pipeline_mode<synchronous>, transform_indices = @transform_0, window_bounds = array<i64: 128, 32>}, {pipeline_mode = #tpu.pipeline_mode<synchronous>, transform_indices = @transform_1, window_bounds = array<i64: 8, 32>}, {pipeline_mode = #tpu.pipeline_mode<synchronous>, transform_indices = @transform_2, window_bounds = array<i64: 2, 32>}, {transform_indices = @transform_3, window_bounds = array<i64: 8, 32>}]} {
    %c8_i32 = arith.constant 8 : i32
    %0 = arith.muli %arg0, %c8_i32 : i32
    %c0_i32 = arith.constant 0 : i32
    %1 = arith.addi %0, %c0_i32 : i32
    %2 = arith.index_cast %1 : i32 to index
    %3 = memref.load %arg1[%2] : memref<16xi32, #tpu.memory_space<smem>>
    %4 = arith.addi %0, %c0_i32 : i32
    %c8_i32_0 = arith.constant 8 : i32
    %c0_i32_1 = arith.constant 0 : i32
    %5 = arith.cmpi eq, %c8_i32_0, %c0_i32_1 : i32
    %c1_i32 = arith.constant 1 : i32
    %6 = arith.select %5, %c1_i32, %c8_i32_0 : i32
    %7 = arith.remsi %4, %6 : i32
    %c0_i32_2 = arith.constant 0 : i32
    %8 = arith.cmpi ne, %7, %c0_i32_2 : i32
    %c0_i32_3 = arith.constant 0 : i32
    %9 = arith.cmpi slt, %7, %c0_i32_3 : i32
    %c0_i32_4 = arith.constant 0 : i32
    %10 = arith.cmpi slt, %6, %c0_i32_4 : i32
    %11 = arith.xori %9, %10 : i1
    %12 = arith.andi %11, %8 : i1
    %13 = arith.addi %7, %6 : i32
    %14 = arith.select %12, %13, %7 : i32
    %15 = arith.index_cast %3 : i32 to index
    %c0 = arith.constant 0 : index
    %16 = vector.load %arg2[%15, %c0] : memref<128x32xf32, #tpu.memory_space<vmem>>, vector<1x32xf32>
    %17 = arith.index_cast %14 : i32 to index
    %c0_5 = arith.constant 0 : index
    %18 = vector.load %arg3[%17, %c0_5] : memref<8x32xf32, #tpu.memory_space<vmem>>, vector<1x32xf32>
    %19 = arith.addf %16, %18 : vector<1x32xf32>
    %20 = arith.index_cast %c0_i32 : i32 to index
    %c0_6 = arith.constant 0 : index
    %21 = vector.load %arg6[%20, %c0_6] : memref<8x32xf32, #tpu.memory_space<vmem>>, vector<1x32xf32>
    tpu.vector_store %arg6[%20, %c0_6], %19 {strides = array<i32>} : memref<8x32xf32, #tpu.memory_space<vmem>>, vector<1x32xf32>,
    %c1_i32_7 = arith.constant 1 : i32
    %22 = arith.addi %0, %c1_i32_7 : i32
    %23 = arith.index_cast %22 : i32 to index
    %24 = memref.load %arg1[%23] : memref<16xi32, #tpu.memory_space<smem>>
    %25 = arith.addi %0, %c1_i32_7 : i32
    %c8_i32_8 = arith.constant 8 : i32
    %c0_i32_9 = arith.constant 0 : i32
    %26 = arith.cmpi eq, %c8_i32_8, %c0_i32_9 : i32
    %c1_i32_10 = arith.constant 1 : i32
    %27 = arith.select %26, %c1_i32_10, %c8_i32_8 : i32
    %28 = arith.remsi %25, %27 : i32
    %c0_i32_11 = arith.constant 0 : i32
    %29 = arith.cmpi ne, %28, %c0_i32_11 : i32
    %c0_i32_12 = arith.constant 0 : i32
    %30 = arith.cmpi slt, %28, %c0_i32_12 : i32
    %c0_i32_13 = arith.constant 0 : i32
    %31 = arith.cmpi slt, %27, %c0_i32_13 : i32
    %32 = arith.xori %30, %31 : i1
    %33 = arith.andi %32, %29 : i1
    %34 = arith.addi %28, %27 : i32
    %35 = arith.select %33, %34, %28 : i32
    %36 = arith.index_cast %24 : i32 to index
    %c0_14 = arith.constant 0 : index
    %37 = vector.load %arg2[%36, %c0_14] : memref<128x32xf32, #tpu.memory_space<vmem>>, vector<1x32xf32>
    %38 = arith.index_cast %35 : i32 to index
    %c0_15 = arith.constant 0 : index
    %39 = vector.load %arg3[%38, %c0_15] : memref<8x32xf32, #tpu.memory_space<vmem>>, vector<1x32xf32>
    %40 = arith.addf %37, %39 : vector<1x32xf32>
    %41 = arith.index_cast %c1_i32_7 : i32 to index
    %c0_16 = arith.constant 0 : index
    %42 = vector.load %arg6[%41, %c0_16] : memref<8x32xf32, #tpu.memory_space<vmem>>, vector<1x32xf32>
    tpu.vector_store %arg6[%41, %c0_16], %40 {strides = array<i32>} : memref<8x32xf32, #tpu.memory_space<vmem>>, vector<1x32xf32>,
    %c2_i32 = arith.constant 2 : i32
    %43 = arith.addi %0, %c2_i32 : i32
    %44 = arith.index_cast %43 : i32 to index
    %45 = memref.load %arg1[%44] : memref<16xi32, #tpu.memory_space<smem>>
    %46 = arith.addi %0, %c2_i32 : i32
    %c8_i32_17 = arith.constant 8 : i32
    %c0_i32_18 = arith.constant 0 : i32
    %47 = arith.cmpi eq, %c8_i32_17, %c0_i32_18 : i32
    %c1_i32_19 = arith.constant 1 : i32
    %48 = arith.select %47, %c1_i32_19, %c8_i32_17 : i32
    %49 = arith.remsi %46, %48 : i32
    %c0_i32_20 = arith.constant 0 : i32
    %50 = arith.cmpi ne, %49, %c0_i32_20 : i32
    %c0_i32_21 = arith.constant 0 : i32
    %51 = arith.cmpi slt, %49, %c0_i32_21 : i32
    %c0_i32_22 = arith.constant 0 : i32
    %52 = arith.cmpi slt, %48, %c0_i32_22 : i32
    %53 = arith.xori %51, %52 : i1
    %54 = arith.andi %53, %50 : i1
    %55 = arith.addi %49, %48 : i32
    %56 = arith.select %54, %55, %49 : i32
    %57 = arith.index_cast %45 : i32 to index
    %c0_23 = arith.constant 0 : index
    %58 = vector.load %arg2[%57, %c0_23] : memref<128x32xf32, #tpu.memory_space<vmem>>, vector<1x32xf32>
    %59 = arith.index_cast %56 : i32 to index
    %c0_24 = arith.constant 0 : index
    %60 = vector.load %arg3[%59, %c0_24] : memref<8x32xf32, #tpu.memory_space<vmem>>, vector<1x32xf32>
    %61 = arith.addf %58, %60 : vector<1x32xf32>
    %62 = arith.index_cast %c2_i32 : i32 to index
    %c0_25 = arith.constant 0 : index
    %63 = vector.load %arg6[%62, %c0_25] : memref<8x32xf32, #tpu.memory_space<vmem>>, vector<1x32xf32>
    tpu.vector_store %arg6[%62, %c0_25], %61 {strides = array<i32>} : memref<8x32xf32, #tpu.memory_space<vmem>>, vector<1x32xf32>,
    %c3_i32 = arith.constant 3 : i32
    %64 = arith.addi %0, %c3_i32 : i32
    %65 = arith.index_cast %64 : i32 to index
    %66 = memref.load %arg1[%65] : memref<16xi32, #tpu.memory_space<smem>>
    %67 = arith.addi %0, %c3_i32 : i32
    %c8_i32_26 = arith.constant 8 : i32
    %c0_i32_27 = arith.constant 0 : i32
    %68 = arith.cmpi eq, %c8_i32_26, %c0_i32_27 : i32
    %c1_i32_28 = arith.constant 1 : i32
    %69 = arith.select %68, %c1_i32_28, %c8_i32_26 : i32
    %70 = arith.remsi %67, %69 : i32
    %c0_i32_29 = arith.constant 0 : i32
    %71 = arith.cmpi ne, %70, %c0_i32_29 : i32
    %c0_i32_30 = arith.constant 0 : i32
    %72 = arith.cmpi slt, %70, %c0_i32_30 : i32
    %c0_i32_31 = arith.constant 0 : i32
    %73 = arith.cmpi slt, %69, %c0_i32_31 : i32
    %74 = arith.xori %72, %73 : i1
    %75 = arith.andi %74, %71 : i1
    %76 = arith.addi %70, %69 : i32
    %77 = arith.select %75, %76, %70 : i32
    %78 = arith.index_cast %66 : i32 to index
    %c0_32 = arith.constant 0 : index
    %79 = vector.load %arg2[%78, %c0_32] : memref<128x32xf32, #tpu.memory_space<vmem>>, vector<1x32xf32>
    %80 = arith.index_cast %77 : i32 to index
    %c0_33 = arith.constant 0 : index
    %81 = vector.load %arg3[%80, %c0_33] : memref<8x32xf32, #tpu.memory_space<vmem>>, vector<1x32xf32>
    %82 = arith.addf %79, %81 : vector<1x32xf32>
    %83 = arith.index_cast %c3_i32 : i32 to index
    %c0_34 = arith.constant 0 : index
    %84 = vector.load %arg6[%83, %c0_34] : memref<8x32xf32, #tpu.memory_space<vmem>>, vector<1x32xf32>
    tpu.vector_store %arg6[%83, %c0_34], %82 {strides = array<i32>} : memref<8x32xf32, #tpu.memory_space<vmem>>, vector<1x32xf32>,
    %c4_i32 = arith.constant 4 : i32
    %85 = arith.addi %0, %c4_i32 : i32
    %86 = arith.index_cast %85 : i32 to index
    %87 = memref.load %arg1[%86] : memref<16xi32, #tpu.memory_space<smem>>
    %88 = arith.addi %0, %c4_i32 : i32
    %c8_i32_35 = arith.constant 8 : i32
    %c0_i32_36 = arith.constant 0 : i32
    %89 = arith.cmpi eq, %c8_i32_35, %c0_i32_36 : i32
    %c1_i32_37 = arith.constant 1 : i32
    %90 = arith.select %89, %c1_i32_37, %c8_i32_35 : i32
    %91 = arith.remsi %88, %90 : i32
    %c0_i32_38 = arith.constant 0 : i32
    %92 = arith.cmpi ne, %91, %c0_i32_38 : i32
    %c0_i32_39 = arith.constant 0 : i32
    %93 = arith.cmpi slt, %91, %c0_i32_39 : i32
    %c0_i32_40 = arith.constant 0 : i32
    %94 = arith.cmpi slt, %90, %c0_i32_40 : i32
    %95 = arith.xori %93, %94 : i1
    %96 = arith.andi %95, %92 : i1
    %97 = arith.addi %91, %90 : i32
    %98 = arith.select %96, %97, %91 : i32
    %99 = arith.index_cast %87 : i32 to index
    %c0_41 = arith.constant 0 : index
    %100 = vector.load %arg2[%99, %c0_41] : memref<128x32xf32, #tpu.memory_space<vmem>>, vector<1x32xf32>
    %101 = arith.index_cast %98 : i32 to index
    %c0_42 = arith.constant 0 : index
    %102 = vector.load %arg3[%101, %c0_42] : memref<8x32xf32, #tpu.memory_space<vmem>>, vector<1x32xf32>
    %103 = arith.addf %100, %102 : vector<1x32xf32>
    %104 = arith.index_cast %c4_i32 : i32 to index
    %c0_43 = arith.constant 0 : index
    %105 = vector.load %arg6[%104, %c0_43] : memref<8x32xf32, #tpu.memory_space<vmem>>, vector<1x32xf32>
    tpu.vector_store %arg6[%104, %c0_43], %103 {strides = array<i32>} : memref<8x32xf32, #tpu.memory_space<vmem>>, vector<1x32xf32>,
    %c5_i32 = arith.constant 5 : i32
    %106 = arith.addi %0, %c5_i32 : i32
    %107 = arith.index_cast %106 : i32 to index
    %108 = memref.load %arg1[%107] : memref<16xi32, #tpu.memory_space<smem>>
    %109 = arith.addi %0, %c5_i32 : i32
    %c8_i32_44 = arith.constant 8 : i32
    %c0_i32_45 = arith.constant 0 : i32
    %110 = arith.cmpi eq, %c8_i32_44, %c0_i32_45 : i32
    %c1_i32_46 = arith.constant 1 : i32
    %111 = arith.select %110, %c1_i32_46, %c8_i32_44 : i32
    %112 = arith.remsi %109, %111 : i32
    %c0_i32_47 = arith.constant 0 : i32
    %113 = arith.cmpi ne, %112, %c0_i32_47 : i32
    %c0_i32_48 = arith.constant 0 : i32
    %114 = arith.cmpi slt, %112, %c0_i32_48 : i32
    %c0_i32_49 = arith.constant 0 : i32
    %115 = arith.cmpi slt, %111, %c0_i32_49 : i32
    %116 = arith.xori %114, %115 : i1
    %117 = arith.andi %116, %113 : i1
    %118 = arith.addi %112, %111 : i32
    %119 = arith.select %117, %118, %112 : i32
    %120 = arith.index_cast %108 : i32 to index
    %c0_50 = arith.constant 0 : index
    %121 = vector.load %arg2[%120, %c0_50] : memref<128x32xf32, #tpu.memory_space<vmem>>, vector<1x32xf32>
    %122 = arith.index_cast %119 : i32 to index
    %c0_51 = arith.constant 0 : index
    %123 = vector.load %arg3[%122, %c0_51] : memref<8x32xf32, #tpu.memory_space<vmem>>, vector<1x32xf32>
    %124 = arith.addf %121, %123 : vector<1x32xf32>
    %125 = arith.index_cast %c5_i32 : i32 to index
    %c0_52 = arith.constant 0 : index
    %126 = vector.load %arg6[%125, %c0_52] : memref<8x32xf32, #tpu.memory_space<vmem>>, vector<1x32xf32>
    tpu.vector_store %arg6[%125, %c0_52], %124 {strides = array<i32>} : memref<8x32xf32, #tpu.memory_space<vmem>>, vector<1x32xf32>,
    %c6_i32 = arith.constant 6 : i32
    %127 = arith.addi %0, %c6_i32 : i32
    %128 = arith.index_cast %127 : i32 to index
    %129 = memref.load %arg1[%128] : memref<16xi32, #tpu.memory_space<smem>>
    %130 = arith.addi %0, %c6_i32 : i32
    %c8_i32_53 = arith.constant 8 : i32
    %c0_i32_54 = arith.constant 0 : i32
    %131 = arith.cmpi eq, %c8_i32_53, %c0_i32_54 : i32
    %c1_i32_55 = arith.constant 1 : i32
    %132 = arith.select %131, %c1_i32_55, %c8_i32_53 : i32
    %133 = arith.remsi %130, %132 : i32
    %c0_i32_56 = arith.constant 0 : i32
    %134 = arith.cmpi ne, %133, %c0_i32_56 : i32
    %c0_i32_57 = arith.constant 0 : i32
    %135 = arith.cmpi slt, %133, %c0_i32_57 : i32
    %c0_i32_58 = arith.constant 0 : i32
    %136 = arith.cmpi slt, %132, %c0_i32_58 : i32
    %137 = arith.xori %135, %136 : i1
    %138 = arith.andi %137, %134 : i1
    %139 = arith.addi %133, %132 : i32
    %140 = arith.select %138, %139, %133 : i32
    %141 = arith.index_cast %129 : i32 to index
    %c0_59 = arith.constant 0 : index
    %142 = vector.load %arg2[%141, %c0_59] : memref<128x32xf32, #tpu.memory_space<vmem>>, vector<1x32xf32>
    %143 = arith.index_cast %140 : i32 to index
    %c0_60 = arith.constant 0 : index
    %144 = vector.load %arg3[%143, %c0_60] : memref<8x32xf32, #tpu.memory_space<vmem>>, vector<1x32xf32>
    %145 = arith.addf %142, %144 : vector<1x32xf32>
    %146 = arith.index_cast %c6_i32 : i32 to index
    %c0_61 = arith.constant 0 : index
    %147 = vector.load %arg6[%146, %c0_61] : memref<8x32xf32, #tpu.memory_space<vmem>>, vector<1x32xf32>
    tpu.vector_store %arg6[%146, %c0_61], %145 {strides = array<i32>} : memref<8x32xf32, #tpu.memory_space<vmem>>, vector<1x32xf32>,
    %c7_i32 = arith.constant 7 : i32
    %148 = arith.addi %0, %c7_i32 : i32
    %149 = arith.index_cast %148 : i32 to index
    %150 = memref.load %arg1[%149] : memref<16xi32, #tpu.memory_space<smem>>
    %151 = arith.addi %0, %c7_i32 : i32
    %c8_i32_62 = arith.constant 8 : i32
    %c0_i32_63 = arith.constant 0 : i32
    %152 = arith.cmpi eq, %c8_i32_62, %c0_i32_63 : i32
    %c1_i32_64 = arith.constant 1 : i32
    %153 = arith.select %152, %c1_i32_64, %c8_i32_62 : i32
    %154 = arith.remsi %151, %153 : i32
    %c0_i32_65 = arith.constant 0 : i32
    %155 = arith.cmpi ne, %154, %c0_i32_65 : i32
    %c0_i32_66 = arith.constant 0 : i32
    %156 = arith.cmpi slt, %154, %c0_i32_66 : i32
    %c0_i32_67 = arith.constant 0 : i32
    %157 = arith.cmpi slt, %153, %c0_i32_67 : i32
    %158 = arith.xori %156, %157 : i1
    %159 = arith.andi %158, %155 : i1
    %160 = arith.addi %154, %153 : i32
    %161 = arith.select %159, %160, %154 : i32
    %162 = arith.index_cast %150 : i32 to index
    %c0_68 = arith.constant 0 : index
    %163 = vector.load %arg2[%162, %c0_68] : memref<128x32xf32, #tpu.memory_space<vmem>>, vector<1x32xf32>
    %164 = arith.index_cast %161 : i32 to index
    %c0_69 = arith.constant 0 : index
    %165 = vector.load %arg3[%164, %c0_69] : memref<8x32xf32, #tpu.memory_space<vmem>>, vector<1x32xf32>
    %166 = arith.addf %163, %165 : vector<1x32xf32>
    %167 = arith.index_cast %c7_i32 : i32 to index
    %c0_70 = arith.constant 0 : index
    %168 = vector.load %arg6[%167, %c0_70] : memref<8x32xf32, #tpu.memory_space<vmem>>, vector<1x32xf32>
    tpu.vector_store %arg6[%167, %c0_70], %166 {strides = array<i32>} : memref<8x32xf32, #tpu.memory_space<vmem>>, vector<1x32xf32>,
    %c8_i32_71 = arith.constant 8 : i32
    %c0_72 = arith.constant 0 : index
    %c0_73 = arith.constant 0 : index
    %169 = vector.load %arg6[%c0_72, %c0_73] : memref<8x32xf32, #tpu.memory_space<vmem>>, vector<8x32xf32>
    %cst = arith.constant dense<0.000000e+00> : vector<8xf32>
    %170 = vector.multi_reduction <add>, %169, %cst [1] : vector<8x32xf32> to vector<8xf32>
    %171 = vector.shape_cast %170 : vector<8xf32> to vector<8x1xf32>
    %cst_74 = arith.constant 3.200000e+01 : f32
    %172 = vector.broadcast %cst_74 : f32 to vector<8x1xf32>
    %173 = arith.divf %171, %172 : vector<8x1xf32>
    %174 = vector.broadcast %173 : vector<8x1xf32> to vector<8x32xf32>
    %175 = arith.subf %169, %174 : vector<8x32xf32>
    %176 = arith.mulf %175, %175 : vector<8x32xf32>
    %cst_75 = arith.constant dense<0.000000e+00> : vector<8xf32>
    %177 = vector.multi_reduction <add>, %176, %cst_75 [1] : vector<8x32xf32> to vector<8xf32>
    %178 = vector.shape_cast %177 : vector<8xf32> to vector<8x1xf32>
    %cst_76 = arith.constant 3.200000e+01 : f32
    %179 = vector.broadcast %cst_76 : f32 to vector<8x1xf32>
    %180 = arith.divf %178, %179 : vector<8x1xf32>
    %cst_77 = arith.constant 9.99999974E-6 : f32
    %181 = vector.broadcast %cst_77 : f32 to vector<8x1xf32>
    %182 = arith.addf %180, %181 : vector<8x1xf32>
    %183 = math.rsqrt %182 : vector<8x1xf32>
    %184 = vector.broadcast %183 : vector<8x1xf32> to vector<8x32xf32>
    %185 = arith.mulf %175, %184 : vector<8x32xf32>
    %c0_78 = arith.constant 0 : index
    %c0_79 = arith.constant 0 : index
    %186 = vector.load %arg4[%c0_78, %c0_79] : memref<2x32xf32, #tpu.memory_space<vmem>>, vector<1x32xf32>
    %c1 = arith.constant 1 : index
    %c0_80 = arith.constant 0 : index
    %187 = vector.load %arg4[%c1, %c0_80] : memref<2x32xf32, #tpu.memory_space<vmem>>, vector<1x32xf32>
    %188 = vector.broadcast %186 : vector<1x32xf32> to vector<8x32xf32>
    %189 = arith.mulf %185, %188 : vector<8x32xf32>
    %190 = vector.broadcast %187 : vector<1x32xf32> to vector<8x32xf32>
    %191 = arith.addf %189, %190 : vector<8x32xf32>
    %c0_81 = arith.constant 0 : index
    %c0_82 = arith.constant 0 : index
    %192 = vector.load %arg5[%c0_81, %c0_82] : memref<8x32xf32, #tpu.memory_space<vmem>>, vector<8x32xf32>
    tpu.vector_store %arg5[%c0_81, %c0_82], %191 {strides = array<i32>} : memref<8x32xf32, #tpu.memory_space<vmem>>, vector<8x32xf32>,
    return
  }
  func.func @transform_0(%arg0: i32, %arg1: memref<16xi32, #tpu.memory_space<smem>>) -> (i32, i32) {
    %c0_i32 = arith.constant 0 : i32
    %c0_i32_0 = arith.constant 0 : i32
    %c0_i32_1 = arith.constant 0 : i32
    return %c0_i32, %c0_i32_0 : i32, i32
  }
  func.func @transform_1(%arg0: i32, %arg1: memref<16xi32, #tpu.memory_space<smem>>) -> (i32, i32) {
    %c0_i32 = arith.constant 0 : i32
    %c0_i32_0 = arith.constant 0 : i32
    %c0_i32_1 = arith.constant 0 : i32
    return %c0_i32, %c0_i32_0 : i32, i32
  }
  func.func @transform_2(%arg0: i32, %arg1: memref<16xi32, #tpu.memory_space<smem>>) -> (i32, i32) {
    %c0_i32 = arith.constant 0 : i32
    %c0_i32_0 = arith.constant 0 : i32
    %c0_i32_1 = arith.constant 0 : i32
    return %c0_i32, %c0_i32_0 : i32, i32
  }
  func.func @transform_3(%arg0: i32, %arg1: memref<16xi32, #tpu.memory_space<smem>>) -> (i32, i32) {
    %c0_i32 = arith.constant 0 : i32
    %c0_i32_0 = arith.constant 0 : i32
    return %arg0, %c0_i32 : i32, i32
  }
}

</mosaic_0001>

<bundles_post_ra>
// kernel: tpu_custom_call.1
= control target key start
LH: loop header
LB: loop body
LE: loop exit
PB: predicated region body
PF: predicated region fallthrough
CT: control target
= control target key end

     0   :  { %s594_s18 = smov [#allocation4]   ;;  %s782_s0 = inlined_call_operand.vmem [shape: s32[16], index: 0, kind: input, shape index: {}]   ;;  %s783_s1 = inlined_call_operand.vmem [shape: f32[128,32], index: 1, kind: input, shape index: {}]   ;;  %s784_s2 = inlined_call_operand.vmem [shape: f32[8,32], index: 2, kind: input, shape index: {}]   ;;  %s785_s3 = inlined_call_operand.vmem [shape: f32[2,32], index: 3, kind: input, shape index: {}]   ;;  %s786_s4 = inlined_call_operand.hbm [shape: f32[16,32], index: 4, kind: output, shape index: {}]  }
   0x1   :  { %s10_s17 = sshll.u32 %s782_s0, 4  ;;  %s11_s17 = int_to_ptr.vmem [resolvable:$true] %s10_s17 }
   0x2   :  { %13 = dma.vmem_to_smem %s11_s17, 16, %s594_s18, [#allocation3] }
   0x3   :  { %572 = dma.done.wait [#allocation3], 16 }
   0x4   :  { %573 = vsyncadd [#allocation3], 4294967280 }
   0x5   :  { %16 = sfence }
   0x6   :  { %17 = vsyncpa [#allocation6], 0 }
   0x7   :  { %19 = vsyncpa [#allocation6 + $0x1], 0  ;;  %s624_s19 = smov 0   ;;  %s626_s20 = smov 0  }
   0x8   :  { %s628_s21 = smov 0   ;;  %s630_s22 = smov 0  }
   0x9 LB: > { %s435_s0 = sadd.s32 4294967295, %s592_s22   ;;  %s436_s23 = sadd.s32 4294967294, %s592_s22   ;;  %s592_s22 = sphi %s630_s22, %s792_s22   ;;  %s588_s21 = sphi %s628_s21, %s791_s21   ;;  %s584_s20 = sphi %s626_s20, %s790_s20   ;;  %s580_s19 = sphi %s624_s19, %s789_s19  }
   0xa   : > { %s647_s24 = sadd.s32 1, %s592_s22   ;;  %s95_s25 = sadd.s32 1, %s588_s21 }
   0xb   : > { %s92_s26 = ssub.s32 %s592_s22, %s647_s24  ;;  %p105_p0 = scmp.ne.s32.totalorder %s588_s21, %s584_s20 }
   0xc   : > { %p93_p1 = scmp.eq.s32.totalorder %s92_s26, 0  ;;  %p106_p2 = scmp.eq.s32.totalorder %s435_s0, 1 }
   0xd   : > { %p111_p3 = scmp.ne.s32.totalorder %s584_s20, %s580_s19  ;;  %p112_p4 = scmp.eq.s32.totalorder %s436_s23, 1 }
   0xe   : > { %s657_s27 = scalar_select %p93_p1, %s588_s21, %s95_s25  }
   0xf   : > { %p659_p5 = por %p106_p2, %p105_p0  ;;  %p663_p6 = por %p112_p4, %p111_p3 }
  0x10   : > { %p438_p7 = scmp.ge.s32.totalorder %s592_s22, 1  ;;  %p139_p8 = scmp.lt.s32.totalorder %s592_s22, 3 }
  0x12   : > { %p140_p9 = pnand %p438_p7, %p139_p8 }
  0x13   : > { %s669_s30 = sshll.u32 (!%p140_p9), %s435_s0, 3 }
  0x14   : > { %143 = sbr.rel (%p140_p9) target bundleno = 357 (0x165), region = 32  ;;  %s159_s5 = sld [smem:[#allocation4 + %s669_s30]] (!%p140_p9) }
  0x15   : > { %p160_p10 = scmp.lt.s32.totalorder (!%p140_p9), %s669_s30, 0  ;;  %s161_s6 = ssub.s32 (!%p140_p9), 0, %s669_s30 }
  0x16   : > { %s179_s7 = sadd.s32 (!%p140_p9), 1, %s669_s30  ;;  %s441_s8 = smin.u32 (!%p140_p9), %s669_s30, %s161_s6 }
  0x17   : > { %s163_s9 = sand.u32 (!%p140_p9), 7, %s441_s8   ;;  %s180_s10 = sld [smem:[#allocation4 + %s179_s7]] (!%p140_p9) }
  0x18   : > { %s164_s11 = ssub.s32 (!%p140_p9), 0, %s163_s9  ;;  %s182_s12 = ssub.s32 (!%p140_p9), 0, %s179_s7 }
  0x19   : > { %s794_s11 = smov (!%p160_p10, %s164_s11), %s163_s9  ;;  %s444_s16 = smin.u32 %s182_s12, %s179_s7  ;;  %vm177_vm0 = vcmask 253952   ;;  %vm320_vm1 = vcmask 261120   ;;  %v595_v26 = vmov 32.0   ;;  %v510_v47 = vld [vmem:[%s785_s3] ss:$0 sm:$0xff] }
  0x1a   : > { %s172_s15 = scalar_lea.vmem %s783_s1, %s159_s5  ;;  %p443_p11 = scmp.lt.s32.totalorder %s794_s11, 0  ;;  %512 = vrcp.f32 %v595_v26  ;;  %v511_v50 = vld [vmem:[%s785_s3 + $0x1] ss:$0 sm:$0xff] }
  0x1b   : > { %s170_s17 = sadd.s32 8, %s794_s11  ;;  %p181_p12 = scmp.lt.s32.totalorder %s179_s7, 0  ;;  %v173_v0 = vld [vmem:[%s172_s15] sm:$0x1] }
  0x1c   : > { %s184_s18 = sand.u32 7, %s444_s16   ;;  %s796_s17 = smov (!%p443_p11, %s170_s17), %s794_s11 }
  0x1d   : > { %s185_s0 = ssub.s32 0, %s184_s18  ;;  %s199_s23 = sadd.s32 2, %s669_s30 }
  0x1e   : > { %s174_s6 = scalar_lea.vmem %s784_s2, %s796_s17  ;;  %s683_s8 = sld [smem:[#allocation4 + %s199_s23]] }
  0x1f   : > { %v175_v1 = vld [vmem:[%s174_s6] sm:$0x1]  ;;  %s798_s0 = smov (!%p181_p12, %s185_s0), %s184_s18  ;;  %s193_s7 = scalar_lea.vmem %s783_s1, %s180_s10 }
  0x20   : > { %v176_v2 = vadd.f32 %v175_v1, %v173_v0  ;;  %s202_s11 = ssub.s32 0, %s199_s23  ;;  %p446_p13 = scmp.lt.s32.totalorder %s798_s0, 0  ;;  %v194_v3 = vld [vmem:[%s193_s7] sm:$0x1]  ;;  %v513_v27 = vpop.eup %512 }
  0x21   : > { %s191_s12 = sadd.s32 8, %s798_s0  ;;  %p201_p0 = scmp.lt.s32.totalorder %s199_s23, 0  ;;  %v325_v28 = vmul.f32 32.0, %v513_v27  ;;  %vm329_vm2 = vweird.f32 %v513_v27 }
  0x22   : > { %178 = vst.msk [vmem:[#allocation2] sm:$0x1] %vm177_vm0, %v176_v2  ;;  %s447_s13 = smin.u32 %s202_s11, %s199_s23  ;;  %s800_s12 = smov (!%p446_p13, %s191_s12), %s798_s0 }
  0x23   : > { %s204_s14 = sand.u32 7, %s447_s13   ;;  %s219_s15 = sadd.s32 3, %s669_s30  ;;  %v326_v29 = vsub.f32 1.0, %v325_v28 }
  0x24   : > { %s195_s18 = scalar_lea.vmem %s784_s2, %s800_s12  ;;  %s205_s25 = ssub.s32 0, %s204_s14 }
  0x25   : > { %v196_v4 = vld [vmem:[%s195_s18] sm:$0x1]  ;;  %s802_s25 = smov (!%p201_p0, %s205_s25), %s204_s14  ;;  %s213_s6 = scalar_lea.vmem %s783_s1, %s683_s8  ;;  %v327_v30 = vmul.f32 %v513_v27, %v326_v29 }
  0x26   : > { %v197_v5 = vadd.f32 %v196_v4, %v194_v3  ;;  %s220_s5 = sld [smem:[#allocation4 + %s219_s15]]  ;;  %p449_p1 = scmp.lt.s32.totalorder %s802_s25, 0  ;;  %v214_v6 = vld [vmem:[%s213_s6] sm:$0x1] }
  0x27   : > { %s211_s23 = sadd.s32 8, %s802_s25  ;;  %p221_p2 = scmp.lt.s32.totalorder %s219_s15, 0  ;;  %v328_v31 = vadd.f32 %v513_v27, %v327_v30 }
  0x28   : > { %198 = vst.msk [vmem:[#allocation2 + $0x1] sm:$0x1] %vm177_vm0, %v197_v5  ;;  %s222_s0 = ssub.s32 0, %s219_s15  ;;  %s804_s23 = smov (!%p449_p1, %s211_s23), %s802_s25 }
  0x29   : > { %s450_s9 = smin.u32 %s222_s0, %s219_s15  ;;  %s239_s7 = sadd.s32 4, %s669_s30  ;;  %v330_v32 = vsel %vm329_vm2, %v513_v27, %v328_v31 }
  0x2a   : > { %s215_s13 = scalar_lea.vmem %s784_s2, %s804_s23  ;;  %s224_s14 = sand.u32 7, %s450_s9  }
  0x2b   : > { %v216_v7 = vld [vmem:[%s215_s13] sm:$0x1]  ;;  %s225_s16 = ssub.s32 0, %s224_s14  ;;  %s240_s8 = sld [smem:[#allocation4 + %s239_s7]] }
  0x2c   : > { %v217_v8 = vadd.f32 %v216_v7, %v214_v6  ;;  %s806_s16 = smov (!%p221_p2, %s225_s16), %s224_s14  ;;  %s233_s10 = scalar_lea.vmem %s783_s1, %s220_s5 }
  0x2d   : > { %s242_s26 = ssub.s32 0, %s239_s7  ;;  %p452_p3 = scmp.lt.s32.totalorder %s806_s16, 0  ;;  %v234_v9 = vld [vmem:[%s233_s10] sm:$0x1] }
  0x2e   : > { %218 = vst.msk [vmem:[#allocation2 + $0x2] sm:$0x1] %vm177_vm0, %v217_v8  ;;  %s231_s15 = sadd.s32 8, %s806_s16  ;;  %p241_p4 = scmp.lt.s32.totalorder %s239_s7, 0 }
  0x2f   : > { %s453_s25 = smin.u32 %s242_s26, %s239_s7  ;;  %s808_s15 = smov (!%p452_p3, %s231_s15), %s806_s16 }
  0x30   : > { %s244_s6 = sand.u32 7, %s453_s25   ;;  %s259_s23 = sadd.s32 5, %s669_s30 }
  0x31   : > { %s235_s11 = scalar_lea.vmem %s784_s2, %s808_s15  ;;  %s245_s12 = ssub.s32 0, %s244_s6 }
  0x32   : > { %v236_v10 = vld [vmem:[%s235_s11] sm:$0x1]  ;;  %s810_s12 = smov (!%p241_p4, %s245_s12), %s244_s6  ;;  %s253_s14 = scalar_lea.vmem %s783_s1, %s240_s8 }
  0x33   : > { %v237_v11 = vadd.f32 %v236_v10, %v234_v9  ;;  %s260_s17 = sld [smem:[#allocation4 + %s259_s23]]  ;;  %p455_p7 = scmp.lt.s32.totalorder %s810_s12, 0  ;;  %v254_v12 = vld [vmem:[%s253_s14] sm:$0x1] }
  0x34   : > { %s251_s7 = sadd.s32 8, %s810_s12  ;;  %p261_p8 = scmp.lt.s32.totalorder %s259_s23, 0 }
  0x35   : > { %238 = vst.msk [vmem:[#allocation2 + $0x3] sm:$0x1] %vm177_vm0, %v237_v11  ;;  %s262_s16 = ssub.s32 0, %s259_s23  ;;  %s812_s7 = smov (!%p455_p7, %s251_s7), %s810_s12 }
  0x36   : > { %s456_s18 = smin.u32 %s262_s16, %s259_s23  ;;  %s279_s10 = sadd.s32 6, %s669_s30 }
  0x37   : > { %s255_s25 = scalar_lea.vmem %s784_s2, %s812_s7  ;;  %s264_s6 = sand.u32 7, %s456_s18  }
  0x38   : > { %v256_v13 = vld [vmem:[%s255_s25] sm:$0x1]  ;;  %s265_s0 = ssub.s32 0, %s264_s6  ;;  %s280_s8 = sld [smem:[#allocation4 + %s279_s10]] }
  0x39   : > { %v257_v14 = vadd.f32 %v256_v13, %v254_v12  ;;  %s814_s0 = smov (!%p261_p8, %s265_s0), %s264_s6  ;;  %s273_s5 = scalar_lea.vmem %s783_s1, %s260_s17 }
  0x3a   : > { %s282_s13 = ssub.s32 0, %s279_s10  ;;  %p458_p9 = scmp.lt.s32.totalorder %s814_s0, 0  ;;  %v274_v15 = vld [vmem:[%s273_s5] sm:$0x1] }
  0x3b   : > { %258 = vst.msk [vmem:[#allocation2 + $0x4] sm:$0x1] %vm177_vm0, %v257_v14  ;;  %s271_s23 = sadd.s32 8, %s814_s0  ;;  %p281_p10 = scmp.lt.s32.totalorder %s279_s10, 0 }
  0x3c   : > { %s459_s12 = smin.u32 %s282_s13, %s279_s10  ;;  %s816_s23 = smov (!%p458_p9, %s271_s23), %s814_s0 }
  0x3d   : > { %s284_s14 = sand.u32 7, %s459_s12   ;;  %s299_s7 = sadd.s32 7, %s669_s30 }
  0x3e   : > { %s275_s26 = scalar_lea.vmem %s784_s2, %s816_s23  ;;  %s285_s15 = ssub.s32 0, %s284_s14 }
  0x3f   : > { %v276_v16 = vld [vmem:[%s275_s26] sm:$0x1]  ;;  %s818_s15 = smov (!%p281_p10, %s285_s15), %s284_s14  ;;  %s293_s6 = scalar_lea.vmem %s783_s1, %s280_s8 }
  0x40   : > { %v277_v17 = vadd.f32 %v276_v16, %v274_v15  ;;  %s300_s9 = sld [smem:[#allocation4 + %s299_s7]]  ;;  %p461_p11 = scmp.lt.s32.totalorder %s818_s15, 0  ;;  %v294_v18 = vld [vmem:[%s293_s6] sm:$0x1] }
  0x41   : > { %s291_s11 = sadd.s32 8, %s818_s15  ;;  %p301_p12 = scmp.lt.s32.totalorder %s299_s7, 0 }
  0x42   : > { %278 = vst.msk [vmem:[#allocation2 + $0x5] sm:$0x1] %vm177_vm0, %v277_v17  ;;  %s302_s10 = ssub.s32 0, %s299_s7  ;;  %s820_s11 = smov (!%p461_p11, %s291_s11), %s818_s15 }
  0x43   : > { %s462_s0 = smin.u32 %s302_s10, %s299_s7  ;;  %s295_s23 = scalar_lea.vmem %s784_s2, %s820_s11 }
  0x44   : > { %s304_s12 = sand.u32 7, %s462_s0   ;;  %v296_v19 = vld [vmem:[%s295_s23] sm:$0x1]  ;;  %s155_s25 = sand.u32 1, %s584_s20  }
  0x45   : > { %s305_s14 = ssub.s32 0, %s304_s12  ;;  %v297_v20 = vadd.f32 %v296_v19, %v294_v18  ;;  %s439_s6 = sshll.u32 %s155_s25, 3 }
  0x46   : > { %s822_s14 = smov (!%p301_p12, %s305_s14), %s304_s12  ;;  %s313_s18 = scalar_lea.vmem %s783_s1, %s300_s9 }
  0x47   : > { %298 = vst.msk [vmem:[#allocation2 + $0x6] sm:$0x1] %vm177_vm0, %v297_v20  ;;  %p464_p13 = scmp.lt.s32.totalorder %s822_s14, 0  ;;  %s311_s26 = sadd.s32 8, %s822_s14  ;;  %v314_v21 = vld [vmem:[%s313_s18] sm:$0x1] }
  0x48   : > { %s368_s5 = scalar_lea.hbm %s786_s4, %s669_s30  ;;  %s157_s12 = scalar_lea.vmem [#allocation5], %s439_s6 }
  0x49   : > { %s824_s26 = smov (!%p464_p13, %s311_s26), %s822_s14  ;;  %s370_s14 = sshll.u32 %s157_s12, 4  ;;  %s371_s14 = int_to_ptr.vmem [resolvable:$true] %s370_s14 }
  0x4a   : > { %s315_s17 = scalar_lea.vmem %s784_s2, %s824_s26  ;;  %s372_s8 = sshll.u32 %s368_s5, 4  ;;  %s373_s8 = int_to_ptr.hbm [resolvable:$true] %s372_s8 }
  0x4b   : > { %v316_v22 = vld [vmem:[%s315_s17] sm:$0x1]  ;;  %s358_s16 = scalar_lea.sflag [#allocation6], %s155_s25  ;;  %s542_s18 = sshra.s32 %s373_s8, 4  ;;  %s543_s18 = int_to_ptr.hbm [resolvable:$true] %s542_s18 }
  0x4c   : > { %v317_v23 = vadd.f32 %v316_v22, %v314_v21  ;;  %s544_s30 = scalar_lea.hbm %s543_s18, 8  ;;  %s548_s15 = scalar_lea.hbm %s786_s4, 16 }
  0x4d   : > { %p545_p0 = scmp.ne.s32.totalorder %s543_s18, %s544_s30  ;;  %p549_p3 = scmp.lt.s32.totalorder %s543_s18, %s786_s4 }
  0x4e   : > { %318 = vst.msk [vmem:[#allocation2 + $0x7] sm:$0x1] %vm177_vm0, %v317_v23  ;;  %p550_p4 = scmp.lt.s32.totalorder %s548_s15, %s544_s30 }
  0x4f   : > { %p546_p1 = pnand %p545_p0, %p659_p5 }
  0x50   : > { %p551_p7 = por %p550_p4, %p549_p3 }
  0x51   : > { %p547_p2 = pneg %p546_p1 }
  0x53   : > { %p552_p8 = pnand %p551_p7, %p547_p2 }
  0x55   : > { %v319_v24 = vld [vmem:[#allocation2] sm:$0xff] }
  0x56   : > { %v321_v25 = vsel %vm320_vm1, %v319_v24, 0.0 }
  0x57   : > { %322 = vadd.xlane.f32.xlu0 %v321_v25 }
  0xca   : > { %v323_v33 = vpop.xlane.xlu0 %322 }
  0xcb   : > { %v331_v34 = vmul.f32 %v330_v32, %v323_v33 }
  0xcd   : > { %v332_v35 = vsub.f32 %v319_v24, %v331_v34 }
  0xcf   : > { %v333_v36 = vmul.f32 %v332_v35, %v332_v35 }
  0xd1   : > { %v334_v37 = vsel %vm320_vm1, %v333_v36, 0.0 }
  0xd2   : > { %335 = vadd.xlane.f32.xlu0 %v334_v37 }
 0x145   : > { %v336_v38 = vpop.xlane.xlu0 %335 }
 0x146   : > { %v337_v39 = vmul.f32 %v336_v38, %v330_v32 }
 0x148   : > { %v338_v40 = vadd.f32 1e-05, %v337_v39 }
 0x14a   : > { %514 = vrsqrt.f32 %v338_v40  ;;  %vm345_vm4 = vweird.f32 %v338_v40 }
 0x150   : > { %v515_v41 = vpop.eup %514 }
 0x151   : > { %v340_v42 = vmul.f32 %v515_v41, %v338_v40  ;;  %vm346_vm3 = vweird.f32 %v515_v41 }
 0x152   : > { %vm347_vm5 = vmor %vm345_vm4, %vm346_vm3 }
 0x153   : > { %v341_v43 = vmul.f32 %v515_v41, %v340_v42 }
 0x155   : > { %v342_v44 = vmul.f32 0.5, %v341_v43 }
 0x157   : > { %v343_v45 = vsub.f32 1.5, %v342_v44 }
 0x159   : > { %v344_v46 = vmul.f32 %v515_v41, %v343_v45 }
 0x15b   : > { %v348_v48 = vsel %vm347_vm5, %v515_v41, %v344_v46 }
 0x15c   : > { %v349_v49 = vmul.f32 %v348_v48, %v332_v35 }
 0x15e   : > { %v353_v51 = vmul.f32 %v510_v47, %v349_v49 }
 0x160   : > { %v355_v52 = vadd.f32 %v511_v50, %v353_v51 }
 0x162   : > { %356 = vst.msk [vmem:[%s157_s12] sm:$0xff] %vm320_vm1, %v355_v52 }
 0x163   : > { %555 = shalt.err (!%p552_p8)
}
 0x164   : > { %469 = dma.vmem_to_hbm [thread:$0]  (%p659_p5), %s371_s14, 128, %s373_s8, %s358_s16  }
 0x165 PF: > { %p475_p9 = scmp.ge.s32.totalorder %s592_s22, 2  ;;  %s384_s25 = sand.u32 1, %s580_s19  }
 0x166   : > { %s385_s9 = scalar_lea.sflag [#allocation6], %s384_s25 }
 0x167   : > { %p472_p10 = pnand %p475_p9, %p663_p6 }
 0x169   : > { %p473_p11 = pneg %p472_p10 }
 0x16b   : > { %575 = dma.done.wait (%p473_p11), %s385_s9, 128  }
 0x16c   : > { %577 = vsyncadd (%p473_p11), %s385_s9, 4294967168  ;;  %p22_p12 = scmp.ge.s32.totalorder %s647_s24, 4   ;;  %s789_s19 = smov %s584_s20 }
 0x16d   : > { %s790_s20 = smov %s588_s21  ;;  %s791_s21 = smov %s657_s27 }
 0x16e   : > { %s792_s22 = smov %s647_s24  ;;  %24 = sbr.rel (!%p22_p12) target bundleno = 9 (0x9), region = 80 }
 0x173   :  { %391 = vsyncpa [#allocation6], 1 }
 0x174   :  { %393 = vsyncpa [#allocation6 + $0x1], 1 }

</bundles_post_ra>
